<compile_context>
chip_gen: v5e
topology: v5e:2x2
jax: 0.10.0
libtpu: 0.0.40
codegen_flags: <defaults>
</compile_context>

<pallas_src>
import functools

import jax
import jax.numpy as jnp
from jax.experimental import pallas as pl
from jax.experimental.pallas import tpu as pltpu


def _tce_kernel(x_ref, tgt_ref, out_ref):
    # x_ref   : (tile_r, C) block of flattened rows x[n, t, :]
    # tgt_ref : (num_tiles, tile_r, 1) whole permuted target, VMEM-resident
    # out_ref : (1, 1) per-tile partial sum (leading grid dim squeezed)
    i = pl.program_id(0)

    # Upcast once per tile (no-op for f32; halves HBM bytes for bf16 inputs).
    x = x_ref[...].astype(jnp.float32)                              # (tile_r, C)
    tgt = tgt_ref[i]                                                # (tile_r, 1) int32

    # loss[r] = logsumexp(x[r, :]) - x[r, tgt[r]]   (single stable pass,
    # no materialized log-prob tensor; the reference's 2nd log_softmax is the
    # identity on log-probabilities).
    row_max = jnp.max(x, axis=-1, keepdims=True)                    # (tile_r, 1)
    lse = row_max + jnp.log(
        jnp.sum(jnp.exp(x - row_max), axis=-1, keepdims=True))      # (tile_r, 1)

    # Gather x[r, tgt[r]] via a onehot select-sum.  C stays untiled (block spans
    # the full class dim), so lane padding for non-multiple-of-128 C is handled
    # by the compiler's masked reductions — no explicit lane mask needed.
    col = jax.lax.broadcasted_iota(jnp.int32, x.shape, 1)           # (tile_r, C)
    picked = jnp.sum(jnp.where(col == tgt, x, 0.0),
                     axis=-1, keepdims=True)                        # (tile_r, 1)

    # null_mask: target == 0 contributes zero loss (this also neutralizes any
    # padded / ragged-last-block rows, whose target was padded with 0).
    losses = jnp.where(tgt == 0, 0.0, lse - picked)                 # (tile_r, 1)

    out_ref[...] = jnp.sum(losses, axis=0, keepdims=True)           # (1, 1)


def temporal_cross_entropy_loss(x, target, batch_average=False,
                                time_average=False, tile_rows=None):
    """x: (N, T, C) float, target: (N, T) int. Returns scalar loss (N must == T)."""
    N, T, C = x.shape
    assert N == T, "torch.gather in the reference forward is only valid when N == T"

    R = N * T
    # Free reshape (contiguous leading dims) — the activations are NOT
    # transposed or copied in HBM.  Only the tiny target gets permuted.
    x_rows = x.reshape(R, C)
    tgt_rows = jnp.transpose(target.astype(jnp.int32)).reshape(R)   # tgt_rows[n*T+t] = target[t, n]

    if tile_rows is None:
        # ~2 MiB of activation rows per block: big enough to amortize the
        # ~0.35us/step grid overhead, small enough that double-buffering fits
        # comfortably in v7x's 64 MiB VMEM (and v5e/v6e's 128 MiB).
        tile_rows = max(8, ((2 * 1024 * 1024) // (C * 4)) // 8 * 8)
    tile_r = R if R <= tile_rows else int(tile_rows)
    if tile_r < R:
        tile_r = max(8, (tile_r // 8) * 8)   # sublane-dim block must be a multiple of 8
    num_tiles = pl.cdiv(R, tile_r)
    r_pad = num_tiles * tile_r
    if r_pad != R:
        # Pad only the tiny target (class 0 => masked to zero loss).  x itself
        # is never copied: the ragged last block's extra rows read unspecified
        # data that the tgt==0 select discards.
        tgt_rows = jnp.pad(tgt_rows, (0, r_pad - R))
    tgt3 = tgt_rows.reshape(num_tiles, tile_r, 1)

    block_bytes = tile_r * C * 4
    vmem_limit = int(min(64 * 1024 * 1024,
                         max(8 * 1024 * 1024, 4 * block_bytes + (2 << 20))))

    partial = pl.pallas_call(
        _tce_kernel,
        out_shape=jax.ShapeDtypeStruct((num_tiles, 1, 1), jnp.float32),
        grid_spec=pltpu.PrefetchScalarGridSpec(
            num_scalar_prefetch=0,
            grid=(num_tiles,),
            in_specs=[
                # Large row tile of the activations, streamed per grid step.
                pl.BlockSpec((tile_r, C), lambda i: (i, 0)),
                # Whole target resident in VMEM (constant block index => one
                # DMA total, no per-step skinny transfer).
                pl.BlockSpec((num_tiles, tile_r, 1), lambda i: (0, 0, 0)),
            ],
            # One partial sum per tile; leading dim squeezed out of the kernel ref.
            out_specs=pl.BlockSpec((None, 1, 1), lambda i: (i, 0, 0)),
        ),
        compiler_params=pltpu.CompilerParams(
            dimension_semantics=("parallel",),   # lets v7x shard tiles across both TCs
            vmem_limit_bytes=vmem_limit,
        ),
    )(x_rows, tgt3)

    loss = jnp.sum(partial)
    if batch_average:
        loss = loss / N
    if time_average:
        loss = loss / T
    return loss


def _log_softmax(v):
    m = jnp.max(v, axis=-1, keepdims=True)
    s = v - m
    return s - jnp.log(jnp.sum(jnp.exp(s), axis=-1, keepdims=True))


def _reference_loss(x, target):
    """Pure-JAX reference with the PyTorch module's exact math (double lsm)."""
    y = jnp.transpose(x, (1, 0, 2))                          # (T, N, C)
    lp = _log_softmax(_log_softmax(y))
    idx = target.astype(jnp.int32)[:, :, None]               # (N, T, 1)
    losses = -jnp.take_along_axis(lp, idx, axis=2)[..., 0]   # (N, T) (needs N==T)
    losses = jnp.where(target == 0, 0.0, losses)
    return jnp.sum(losses)


if __name__ == "__main__":
    N = T = 8
    C = 128
    key = jax.random.PRNGKey(0)
    kx, kt = jax.random.split(key)
    x = jax.random.normal(kx, (N, T, C), dtype=jnp.float32)
    # include zeros so the null_mask path is exercised
    target = jax.random.randint(kt, (N, T), 0, C, dtype=jnp.int32)

    ref = jax.block_until_ready(_reference_loss(x, target))

    # Default path: whole problem in a single grid step.
    loss = jax.block_until_ready(temporal_cross_entropy_loss(x, target))
    assert jnp.allclose(loss, ref, rtol=1e-4, atol=1e-3), (loss, ref)

    # Multi-tile path: exercises the parallel grid, per-tile partial sums,
    # padded target and ragged last activation block.
    loss2 = jax.block_until_ready(
        temporal_cross_entropy_loss(x, target, tile_rows=24))
    assert jnp.allclose(loss2, ref, rtol=1e-4, atol=1e-3), (loss2, ref)

    print("KERNEL_OK")
</pallas_src>

<mosaic_0001>
module attributes {stable_mosaic.version = 11 : i64} {
  func.func @_tce_kernel(%arg0: i32, %arg1: memref<64x128xf32, #tpu.memory_space<vmem>>, %arg2: memref<1x64x1xi32, #tpu.memory_space<vmem>>, %arg3: memref<1x1x1xf32, #tpu.memory_space<vmem>>) attributes {dimension_semantics = [#tpu.dimension_semantics<parallel>], iteration_bounds = array<i64: 1>, scalar_prefetch = 0 : i64, scratch_operands = 0 : i64, tpu.core_type = #tpu.core_type<tc>, window_params = [{transform_indices = @transform_0, window_bounds = array<i64: 64, 128>}, {pipeline_mode = #tpu.pipeline_mode<synchronous>, transform_indices = @transform_1, window_bounds = array<i64: 1, 64, 1>}, {transform_indices = @transform_2, window_bounds = array<i64: 1, 1, 1>}]} {
    %c0 = arith.constant 0 : index
    %c0_0 = arith.constant 0 : index
    %0 = vector.load %arg1[%c0, %c0_0] : memref<64x128xf32, #tpu.memory_space<vmem>>, vector<64x128xf32>
    %1 = arith.index_cast %arg0 : i32 to index
    %c0_1 = arith.constant 0 : index
    %c0_2 = arith.constant 0 : index
    %2 = vector.load %arg2[%1, %c0_1, %c0_2] : memref<1x64x1xi32, #tpu.memory_space<vmem>>, vector<1x64x1xi32>
    %3 = vector.shape_cast %2 : vector<1x64x1xi32> to vector<64x1xi32>
    %cst = arith.constant dense<0xFF800000> : vector<64xf32>
    %4 = vector.multi_reduction <maximumf>, %0, %cst [1] : vector<64x128xf32> to vector<64xf32>
    %5 = vector.shape_cast %4 : vector<64xf32> to vector<64x1xf32>
    %6 = vector.broadcast %5 : vector<64x1xf32> to vector<64x128xf32>
    %7 = arith.subf %0, %6 : vector<64x128xf32>
    %8 = math.exp %7 : vector<64x128xf32>
    %cst_3 = arith.constant dense<0.000000e+00> : vector<64xf32>
    %9 = vector.multi_reduction <add>, %8, %cst_3 [1] : vector<64x128xf32> to vector<64xf32>
    %10 = vector.shape_cast %9 : vector<64xf32> to vector<64x1xf32>
    %11 = math.log %10 : vector<64x1xf32>
    %12 = arith.addf %5, %11 : vector<64x1xf32>
    %13 = tpu.iota {dimensions = array<i32: 1>} : vector<64x128xi32>
    %14 = vector.broadcast %3 : vector<64x1xi32> to vector<64x128xi32>
    %15 = arith.cmpi eq, %13, %14 : vector<64x128xi32>
    %cst_4 = arith.constant 0.000000e+00 : f32
    %16 = vector.broadcast %cst_4 : f32 to vector<64x128xf32>
    %17 = arith.select %15, %0, %16 : vector<64x128xi1>, vector<64x128xf32>
    %cst_5 = arith.constant dense<0.000000e+00> : vector<64xf32>
    %18 = vector.multi_reduction <add>, %17, %cst_5 [1] : vector<64x128xf32> to vector<64xf32>
    %19 = vector.shape_cast %18 : vector<64xf32> to vector<64x1xf32>
    %c0_i32 = arith.constant 0 : i32
    %20 = vector.broadcast %c0_i32 : i32 to vector<64x1xi32>
    %21 = arith.cmpi eq, %3, %20 : vector<64x1xi32>
    %22 = arith.subf %12, %19 : vector<64x1xf32>
    %cst_6 = arith.constant 0.000000e+00 : f32
    %23 = vector.broadcast %cst_6 : f32 to vector<64x1xf32>
    %24 = arith.select %21, %23, %22 : vector<64x1xi1>, vector<64x1xf32>
    %cst_7 = arith.constant dense<0.000000e+00> : vector<1xf32>
    %25 = vector.multi_reduction <add>, %24, %cst_7 [0] : vector<64x1xf32> to vector<1xf32>
    %26 = vector.shape_cast %25 : vector<1xf32> to vector<1x1xf32>
    %c0_8 = arith.constant 0 : index
    %c0_9 = arith.constant 0 : index
    %c0_10 = arith.constant 0 : index
    %27 = vector.load %arg3[%c0_8, %c0_9, %c0_10] : memref<1x1x1xf32, #tpu.memory_space<vmem>>, vector<1x1x1xf32>
    %28 = vector.shape_cast %27 : vector<1x1x1xf32> to vector<1x1xf32>
    %29 = vector.shape_cast %26 : vector<1x1xf32> to vector<1x1x1xf32>
    tpu.vector_store %arg3[%c0_8, %c0_9, %c0_10], %29 {strides = array<i32>} : memref<1x1x1xf32, #tpu.memory_space<vmem>>, vector<1x1x1xf32>,
    return
  }
  func.func @transform_0(%arg0: i32) -> (i32, i32) {
    %c0_i32 = arith.constant 0 : i32
    %c0_i32_0 = arith.constant 0 : i32
    return %arg0, %c0_i32 : i32, i32
  }
  func.func @transform_1(%arg0: i32) -> (i32, i32, i32) {
    %c0_i32 = arith.constant 0 : i32
    %c0_i32_0 = arith.constant 0 : i32
    %c0_i32_1 = arith.constant 0 : i32
    %c0_i32_2 = arith.constant 0 : i32
    return %c0_i32, %c0_i32_0, %c0_i32_1 : i32, i32, i32
  }
  func.func @transform_2(%arg0: i32) -> (i32, i32, i32) {
    %c0_i32 = arith.constant 0 : i32
    %c0_i32_0 = arith.constant 0 : i32
    %c0_i32_1 = arith.constant 0 : i32
    return %arg0, %c0_i32, %c0_i32_0 : i32, i32, i32
  }
}

</mosaic_0001>

<bundles_post_ra>
// kernel: tpu_custom_call.1
= control target key start
LH: loop header
LB: loop body
LE: loop exit
PB: predicated region body
PF: predicated region fallthrough
CT: control target
= control target key end

     0   :  { %v295_v3 = vmov 0   ;;  %s475_s0 = inlined_call_operand.vmem [shape: f32[64,128], index: 0, kind: input, shape index: {}]   ;;  %s476_s1 = inlined_call_operand.vmem [shape: s32[1,64,1], index: 1, kind: input, shape index: {}]   ;;  %s477_s2 = inlined_call_operand.hbm [shape: f32[1,1,1], index: 2, kind: output, shape index: {}]  }
   0x1   :  { %v315_v0 = vld [vmem:[%s475_s0 + $0x10] sm:$0xff]  ;;  %v320_v1 = vld [vmem:[%s475_s0] sm:$0xff]  ;;  %234 = vset.pattern.permute.xlu0 %v295_v3  ;;  %235 = vset.pattern.permute.xlu1 %v295_v3 }
   0x2   :  { %34 = vmax.xlane.f32.xlu1 %v315_v0  ;;  %30 = vmax.xlane.f32.xlu0 %v320_v1  ;;  %v327_v2 = vld [vmem:[%s475_s0 + $0x20] sm:$0xff] }
   0x3   :  { %38 = vmax.xlane.f32.xlu2 %v327_v2 }
   0x4   :  { %236 = vset.pattern.permute.xlu2 %v295_v3 }
   0x5   :  { %7 = vsyncpa [#allocation3], 0  ;;  %v333_v4 = vld [vmem:[%s475_s0 + $0x18] sm:$0xff]  ;;  %v338_v5 = vld [vmem:[%s475_s0 + $0x8] sm:$0xff]  ;;  %v110_v36 = vlaneseq  ;;  %vm192_vm10 = vcmask 7168   ;;  %s223_s15 = sshll.u32 %s477_s2, 4  ;;  %s224_s15 = int_to_ptr.hbm [resolvable:$true] %s223_s15 }
   0x6   :  { %v343_v6 = vld [vmem:[%s475_s0 + $0x28] sm:$0xff]  ;;  %v351_v7 = vld [vmem:[%s475_s0 + $0x38] sm:$0xff]  ;;  %v356_v8 = vld [vmem:[%s475_s0 + $0x30] sm:$0xff] }
   0x7   :  { %v363_v9 = vld [vmem:[%s476_s1 + $0x10] sm:$0xff]  ;;  %v368_v10 = vld [vmem:[%s476_s1] sm:$0xff]  ;;  %v375_v11 = vld [vmem:[%s476_s1 + $0x8] sm:$0xff]  ;;  %v111_v39 = vand.u32 127, %v110_v36 }
   0x8   :  { %v380_v12 = vld [vmem:[%s476_s1 + $0x18] sm:$0xff]  ;;  %v393_v14 = vld [vmem:[%s476_s1 + $0x20] sm:$0xff]  ;;  %v398_v15 = vld [vmem:[%s476_s1 + $0x28] sm:$0xff]  ;;  %vm168_vm8 = vcmp.eq.s32.totalorder %v368_v10, 0  ;;  %vm169_vm9 = vcmp.eq.s32.totalorder %v375_v11, 0  ;;  %vm170_vm11 = vcmp.eq.s32.totalorder %v363_v9, 0 }
   0x9   :  { %v386_v13 = vld [vmem:[%s476_s1 + $0x38] sm:$0xff]  ;;  %v405_v16 = vld [vmem:[%s476_s1 + $0x30] sm:$0xff]  ;;  %vm172_vm12 = vcmp.eq.s32.totalorder %v393_v14, 0  ;;  %vm171_vm13 = vcmp.eq.s32.totalorder %v380_v12, 0  ;;  %vm173_vm14 = vcmp.eq.s32.totalorder %v398_v15, 0  ;;  %s296_s1 = smov [#allocation2]  }
   0xa   :  { %36 = vmax.xlane.f32.xlu1 %v333_v4  ;;  %32 = vmax.xlane.f32.xlu0 %v338_v5  ;;  %vm175_vm15 = vcmp.eq.s32.totalorder %v386_v13, 0  ;;  %s221_s12 = sshll.u32 %s296_s1, 4  ;;  %s222_s12 = int_to_ptr.vmem [resolvable:$true] %s221_s12 }
   0xb   :  { %40 = vmax.xlane.f32.xlu2 %v343_v6 }
  0x12   :  { %44 = vmax.xlane.f32.xlu1 %v351_v7  ;;  %42 = vmax.xlane.f32.xlu0 %v356_v8 }
  0x23   :  { %119 = vperm.xlu2 %236, %v363_v9  }
  0x26   :  { %113 = vperm.xlu0 %234, %v368_v10  }
  0x2b   :  { %116 = vperm.xlu1 %235, %v375_v11   ;;  %122 = vperm.xlu2 %236, %v380_v12  }
  0x2e   :  { %134 = vperm.xlu0 %234, %v386_v13  }
  0x33   :  { %125 = vperm.xlu1 %235, %v393_v14   ;;  %128 = vperm.xlu2 %236, %v398_v15  }
  0x3b   :  { %131 = vperm.xlu1 %235, %v405_v16  }
  0x75   :  { %v408_v17 = vpop.xlane.xlu0 %30  ;;  %v412_v20 = vpop.xlane.xlu1 %34 }
  0x76   :  { %v46_v18 = vsub.f32 %v320_v1, %v408_v17  ;;  %v418_v23 = vpop.xlane.xlu2 %38  ;;  %v48_v45 = vsub.f32 %v315_v0, %v412_v20 }
  0x77   :  { %v50_v26 = vsub.f32 %v327_v2, %v418_v23 }
  0x78   :  { %v54_v19 = vmul.f32 1.442695, %v46_v18  ;;  %v58_v47 = vmul.f32 1.442695, %v48_v45 }
  0x79   :  { %v62_v27 = vmul.f32 1.442695, %v50_v26 }
  0x7a   :  { %237 = vpow2.f32 %v54_v19 }
  0x7d   :  { %v414_v21 = vpop.xlane.xlu0 %32  ;;  %v422_v28 = vpop.xlane.xlu1 %36 }
  0x7e   :  { %v47_v22 = vsub.f32 %v338_v5, %v414_v21  ;;  %v428_v33 = vpop.xlane.xlu2 %40  ;;  %v49_v38 = vsub.f32 %v333_v4, %v422_v28 }
  0x7f   :  { %v51_v49 = vsub.f32 %v343_v6, %v428_v33 }
  0x80   :  { %v56_v24 = vmul.f32 1.442695, %v47_v22  ;;  %v238_v25 = vpop.eup %237  ;;  %v60_v42 = vmul.f32 1.442695, %v49_v38 }
  0x81   :  { %70 = vadd.xlane.f32.xlu2 %v238_v25  ;;  %v64_v54 = vmul.f32 1.442695, %v51_v49 }
  0x82   :  { %239 = vpow2.f32 %v56_v24 }
  0x83   :  { %241 = vpow2.f32 %v62_v27 }
  0x85   :  { %v424_v29 = vpop.xlane.xlu0 %42  ;;  %v430_v35 = vpop.xlane.xlu1 %44 }
  0x86   :  { %v52_v31 = vsub.f32 %v356_v8, %v424_v29  ;;  %v53_v37 = vsub.f32 %v351_v7, %v430_v35  ;;  %v120_v44 = vpop.permute.xlu2 %119 }
  0x87   :  { %vm138_vm2 = vcmp.eq.s32.totalorder %v111_v39, %v120_v44 }
  0x88   :  { %v240_v30 = vpop.eup %239  ;;  %v66_v32 = vmul.f32 1.442695, %v52_v31  ;;  %v68_v41 = vmul.f32 1.442695, %v53_v37  ;;  %v146_v58 = vsel %vm138_vm2, %v315_v0, 0.0 }
  0x89   :  { %72 = vadd.xlane.f32.xlu2 %v240_v30  ;;  %v242_v34 = vpop.eup %241 }
  0x8a   :  { %243 = vpow2.f32 %v66_v32 }
  0x8b   :  { %245 = vpow2.f32 %v68_v41 }
  0x8c   :  { %247 = vpow2.f32 %v60_v42 }
  0x8d   :  { %249 = vpow2.f32 %v58_v47 }
  0x8e   :  { %v123_v53 = vpop.permute.xlu2 %122  ;;  %251 = vpow2.f32 %v64_v54 }
  0x8f   :  { %vm139_vm6 = vcmp.eq.s32.totalorder %v111_v39, %v123_v53 }
  0x90   :  { %v244_v40 = vpop.eup %243 }
  0x91   :  { %78 = vadd.xlane.f32.xlu2 %v242_v34  ;;  %v246_v51 = vpop.eup %245 }
  0x92   :  { %v248_v52 = vpop.eup %247 }
  0x93   :  { %v250_v56 = vpop.eup %249 }
  0x94   :  { %v252_v61 = vpop.eup %251 }
  0x96   :  { %v129_v60 = vpop.permute.xlu2 %128 }
  0x97   :  { %vm141_vm5 = vcmp.eq.s32.totalorder %v111_v39, %v129_v60 }
  0x98   :  { %v114_v43 = vpop.permute.xlu0 %113  ;;  %v149_v63 = vsel %vm141_vm5, %v343_v6, 0.0 }
  0x99   :  { %vm136_vm0 = vcmp.eq.s32.totalorder %v111_v39, %v114_v43  ;;  %82 = vadd.xlane.f32.xlu2 %v244_v40 }
  0x9a   :  { %v144_v46 = vsel %vm136_vm0, %v320_v1, 0.0  ;;  %v147_v1 = vsel %vm139_vm6, %v333_v4, 0.0  ;;  %vm174_vm0 = vcmp.eq.s32.totalorder %v405_v16, 0 }
  0x9b   :  { %152 = vadd.xlane.f32.xlu0 %v144_v46 }
  0x9d   :  { %v117_v48 = vpop.permute.xlu1 %116 }
  0x9e   :  { %vm137_vm1 = vcmp.eq.s32.totalorder %v111_v39, %v117_v48 }
  0x9f   :  { %v145_v50 = vsel %vm137_vm1, %v338_v5, 0.0  ;;  %vm214_vm1 = vcmask 0  }
  0xa0   :  { %154 = vadd.xlane.f32.xlu1 %v145_v50  ;;  %v135_v59 = vpop.permute.xlu0 %134 }
  0xa1   :  { %84 = vadd.xlane.f32.xlu2 %v246_v51  ;;  %vm143_vm4 = vcmp.eq.s32.totalorder %v111_v39, %v135_v59 }
  0xa2   :  { %v151_v62 = vsel %vm143_vm4, %v351_v7, 0.0 }
  0xa3   :  { %76 = vadd.xlane.f32.xlu0 %v248_v52 }
  0xa5   :  { %v126_v55 = vpop.permute.xlu1 %125 }
  0xa6   :  { %vm140_vm3 = vcmp.eq.s32.totalorder %v111_v39, %v126_v55 }
  0xa7   :  { %v148_v57 = vsel %vm140_vm3, %v327_v2, 0.0 }
  0xa8   :  { %74 = vadd.xlane.f32.xlu1 %v250_v56 }
  0xa9   :  { %160 = vadd.xlane.f32.xlu2 %v148_v57 }
  0xab   :  { %156 = vadd.xlane.f32.xlu0 %v146_v58 }
  0xad   :  { %v132_v2 = vpop.permute.xlu1 %131 }
  0xae   :  { %vm142_vm7 = vcmp.eq.s32.totalorder %v111_v39, %v132_v2 }
  0xaf   :  { %v150_v0 = vsel %vm142_vm7, %v356_v8, 0.0 }
  0xb0   :  { %80 = vadd.xlane.f32.xlu1 %v252_v61 }
  0xb1   :  { %166 = vadd.xlane.f32.xlu2 %v151_v62 }
  0xb3   :  { %162 = vadd.xlane.f32.xlu0 %v149_v63 }
  0xb8   :  { %158 = vadd.xlane.f32.xlu1 %v147_v1 }
  0xc0   :  { %164 = vadd.xlane.f32.xlu1 %v150_v0 }
  0xf4   :  { %v71_v3 = vpop.xlane.xlu2 %70 }
  0xf5   :  { %253 = vlog2.f32 %v71_v3 }
  0xfb   :  { %v254_v18 = vpop.eup %253 }
  0xfc   :  { %v73_v5 = vpop.xlane.xlu2 %72  ;;  %v87_v7 = vmul.f32 0.6931472, %v254_v18 }
  0xfd   :  { %255 = vlog2.f32 %v73_v5 }
  0xfe   :  { %v102_v6 = vadd.f32 %v87_v7, %v408_v17 }
 0x103   :  { %v256_v22 = vpop.eup %255 }
 0x104   :  { %v79_v19 = vpop.xlane.xlu2 %78  ;;  %v89_v24 = vmul.f32 0.6931472, %v256_v22 }
 0x105   :  { %257 = vlog2.f32 %v79_v19 }
 0x106   :  { %v103_v27 = vadd.f32 %v89_v24, %v414_v21 }
 0x10b   :  { %v258_v10 = vpop.eup %257 }
 0x10c   :  { %v83_v4 = vpop.xlane.xlu2 %82  ;;  %v95_v42 = vmul.f32 0.6931472, %v258_v10 }
 0x10e   :  { %v153_v25 = vpop.xlane.xlu0 %152  ;;  %v106_v48 = vadd.f32 %v95_v42, %v418_v23 }
 0x10f   :  { %v176_v26 = vsub.f32 %v102_v6, %v153_v25 }
 0x111   :  { %v184_v30 = vsel %vm168_vm8, 0.0, %v176_v26 }
 0x112   :  { %v193_v34 = vsel %vm192_vm10, %v184_v30, 0.0 }
 0x113   :  { %v155_v8 = vpop.xlane.xlu1 %154 }
 0x114   :  { %v177_v31 = vsub.f32 %v103_v27, %v155_v8  ;;  %v85_v38 = vpop.xlane.xlu2 %84 }
 0x116   :  { %v185_v32 = vsel %vm169_vm9, 0.0, %v177_v31  ;;  %v77_v17 = vpop.xlane.xlu0 %76 }
 0x117   :  { %v194_v36 = vsel %vm192_vm10, %v185_v32, 0.0 }
 0x118   :  { %v195_v37 = vadd.f32 %v194_v36, %v193_v34 }
 0x11b   :  { %v75_v39 = vpop.xlane.xlu1 %74 }
 0x11c   :  { %259 = vlog2.f32 %v75_v39  ;;  %v161_v44 = vpop.xlane.xlu2 %160 }
 0x11d   :  { %261 = vlog2.f32 %v77_v17  ;;  %v180_v52 = vsub.f32 %v106_v48, %v161_v44 }
 0x11e   :  { %263 = vlog2.f32 %v85_v38  ;;  %v157_v43 = vpop.xlane.xlu0 %156 }
 0x11f   :  { %v188_v60 = vsel %vm172_vm12, 0.0, %v180_v52 }
 0x120   :  { %v200_v2 = vsel %vm192_vm10, %v188_v60, 0.0 }
 0x122   :  { %v260_v21 = vpop.eup %259 }
 0x123   :  { %v262_v40 = vpop.eup %261  ;;  %v91_v11 = vmul.f32 0.6931472, %v260_v21  ;;  %v81_v41 = vpop.xlane.xlu1 %80 }
 0x124   :  { %265 = vlog2.f32 %v81_v41  ;;  %v93_v46 = vmul.f32 0.6931472, %v262_v40  ;;  %v264_v49 = vpop.eup %263  ;;  %v167_v63 = vpop.xlane.xlu2 %166 }
 0x125   :  { %267 = vlog2.f32 %v83_v4  ;;  %v104_v45 = vadd.f32 %v91_v11, %v412_v20  ;;  %v101_v57 = vmul.f32 0.6931472, %v264_v49 }
 0x126   :  { %v105_v54 = vadd.f32 %v93_v46, %v422_v28  ;;  %v163_v61 = vpop.xlane.xlu0 %162 }
 0x127   :  { %v178_v47 = vsub.f32 %v104_v45, %v157_v43  ;;  %v109_v14 = vadd.f32 %v101_v57, %v430_v35 }
 0x129   :  { %v186_v50 = vsel %vm170_vm11, 0.0, %v178_v47  ;;  %v183_v3 = vsub.f32 %v109_v14, %v167_v63 }
 0x12a   :  { %v266_v51 = vpop.eup %265  ;;  %v196_v53 = vsel %vm192_vm10, %v186_v50, 0.0 }
 0x12b   :  { %v268_v55 = vpop.eup %267  ;;  %v197_v20 = vadd.f32 %v196_v53, %v195_v37  ;;  %v97_v56 = vmul.f32 0.6931472, %v266_v51  ;;  %v159_v9 = vpop.xlane.xlu1 %158  ;;  %v191_v22 = vsel %vm175_vm15, 0.0, %v183_v3 }
 0x12c   :  { %v179_v58 = vsub.f32 %v105_v54, %v159_v9  ;;  %v99_v59 = vmul.f32 0.6931472, %v268_v55  ;;  %v206_v25 = vsel %vm192_vm10, %v191_v22, 0.0 }
 0x12d   :  { %v107_v23 = vadd.f32 %v97_v56, %v428_v33 }
 0x12e   :  { %v187_v62 = vsel %vm171_vm13, 0.0, %v179_v58  ;;  %v108_v15 = vadd.f32 %v99_v59, %v424_v29 }
 0x12f   :  { %v181_v28 = vsub.f32 %v107_v23, %v163_v61  ;;  %v198_v1 = vsel %vm192_vm10, %v187_v62, 0.0 }
 0x130   :  { %v199_v12 = vadd.f32 %v198_v1, %v197_v20 }
 0x131   :  { %v189_v0 = vsel %vm173_vm14, 0.0, %v181_v28 }
 0x132   :  { %v202_v5 = vsel %vm192_vm10, %v189_v0, 0.0  ;;  %v201_v33 = vadd.f32 %v200_v2, %v199_v12 }
 0x133   :  { %v165_v18 = vpop.xlane.xlu1 %164 }
 0x134   :  { %v182_v19 = vsub.f32 %v108_v15, %v165_v18  ;;  %v203_v7 = vadd.f32 %v202_v5, %v201_v33 }
 0x136   :  { %v190_v24 = vsel %vm174_vm0, 0.0, %v182_v19 }
 0x137   :  { %v204_v35 = vsel %vm192_vm10, %v190_v24, 0.0 }
 0x138   :  { %v205_v6 = vadd.f32 %v204_v35, %v203_v7 }
 0x13a   :  { %v207_v26 = vadd.f32 %v206_v25, %v205_v6 }
 0x13c   :  { %v208_v4 = vrot.slane %v207_v26, 4 }
 0x13e   :  { %v209_v27 = vadd.f32 %v208_v4, %v207_v26 }
 0x140   :  { %v210_v8 = vrot.slane %v209_v27, 2 }
 0x142   :  { %v211_v30 = vadd.f32 %v210_v8, %v209_v27 }
 0x144   :  { %v212_v13 = vrot.slane %v211_v30, 1 }
 0x146   :  { %v213_v16 = vadd.f32 %v212_v13, %v211_v30 }
 0x148   :  { %215 = vst.msk [vmem:[#allocation2] sm:$0x1] %vm214_vm1, %v213_v16 }
 0x149   :  { %226 = dma.vmem_to_hbm [thread:$0]  %s222_s12, 16, %s224_s15, [#allocation3]  }
 0x14a   :  { %293 = dma.done.wait [#allocation3], 16  }
 0x14b   :  { %294 = vsyncadd [#allocation3], 4294967280 }
 0x14c   :  { %231 = vsyncpa [#allocation3], 1 }

</bundles_post_ra>
